<compile_context>
chip_gen: v6e
topology: v6e:2x2x1
jax: 0.10.0
libtpu: 0.0.40
codegen_flags: <defaults>
</compile_context>

<pallas_src>
import functools

import jax
import jax.numpy as jnp
from jax.experimental import pallas as pl
from jax.experimental.pallas import tpu as pltpu


# ----------------------------------------------------------------------------
# helpers
# ----------------------------------------------------------------------------
def _shift_lanes(x, s):
    """y[:, i] = x[:, i + s] (static s), zero-filled where i + s is out of range."""
    if s == 0:
        return x
    n = x.shape[1]
    pad = jnp.zeros((x.shape[0], abs(s)), x.dtype)
    if s > 0:
        return jnp.concatenate([x[:, s:], pad], axis=1)
    return jnp.concatenate([pad, x[:, : n + s]], axis=1)


def _tap_masks(H, W):
    """(9, H*W) f32 masks: mask[tap, h*W+w] = 1 iff the 3x3 tap's source pixel
    (h+dy, w+dx) lies inside the image (i.e. the zero-padding contribution)."""
    h = jnp.arange(H)[:, None]
    w = jnp.arange(W)[None, :]
    masks = []
    for ky in range(3):
        for kx in range(3):
            dy, dx = ky - 1, kx - 1
            m = (h + dy >= 0) & (h + dy < H) & (w + dx >= 0) & (w + dx < W)
            masks.append(m.reshape(-1))
    return jnp.stack(masks, axis=0).astype(jnp.float32)


def _fold_params(p, eps=1e-5):
    """Fold eval-mode BN into per-channel scale/shift; reshape conv weights for
    the channel-first kernel layout."""
    s1 = p["norm1_gamma"] / jnp.sqrt(p["norm1_var"] + eps)
    b1 = p["norm1_beta"] - p["norm1_mean"] * s1
    s2 = p["norm2_gamma"] / jnp.sqrt(p["norm2_var"] + eps)
    b2 = p["norm2_beta"] - p["norm2_mean"] * s2
    w1t = p["conv1_w"][:, :, 0, 0]                           # (Cmid, Cin)
    g, cmid = p["conv2_w"].shape[0], p["conv2_w"].shape[1]
    # w2t[(ky*3+kx)*G + g, c] = conv2_w[g, c, ky, kx]
    w2t = jnp.transpose(p["conv2_w"], (2, 3, 0, 1)).reshape(9 * g, cmid)
    return (s1[:, None], b1[:, None], s2[:, None], b2[:, None], w1t, w2t)


# ----------------------------------------------------------------------------
# fused kernel: one batch element per grid step, channel-first (C, H*W) layout
#   x_ref   : (Cin,  H*W)
#   w1t_ref : (Cmid, Cin)        1x1 conv weight
#   s1/b1   : (Cin,  1)          folded BN1 scale/shift
#   s2/b2   : (Cmid, 1)          folded BN2 scale/shift
#   w2t_ref : (9*G,  Cmid)       3x3 conv weight, all taps stacked
#   mask_ref: (9,    H*W)        zero-padding boundary masks
#   o_ref   : (G,    H*W)
# ----------------------------------------------------------------------------
def _dense_layer_kernel(H, W, x_ref, w1t_ref, s1_ref, b1_ref, s2_ref, b2_ref,
                        w2t_ref, mask_ref, o_ref):
    hw = H * W
    x = x_ref[...].astype(jnp.float32)                         # (Cin, HW)
    h = jnp.maximum(x * s1_ref[...] + b1_ref[...], 0.0)        # BN1 + ReLU
    b = jnp.dot(w1t_ref[...], h,
                preferred_element_type=jnp.float32)            # 1x1 conv -> (Cmid, HW)
    b = jnp.maximum(b * s2_ref[...] + b2_ref[...], 0.0)        # BN2 + ReLU

    # 3x3 conv: one wide matmul over all 9 taps, then shifted masked accumulate.
    p = jnp.dot(w2t_ref[...], b,
                preferred_element_type=jnp.float32)            # (9G, HW)
    masks = mask_ref[...]                                      # (9, HW)

    g_out = o_ref.shape[0]
    acc = jnp.zeros((g_out, hw), jnp.float32)
    for ky in range(3):
        for kx in range(3):
            tap = ky * 3 + kx
            s = (ky - 1) * W + (kx - 1)                        # flattened spatial shift
            pt = p[tap * g_out:(tap + 1) * g_out, :]           # (G, HW)
            pt = _shift_lanes(pt, s)
            acc = acc + pt * masks[tap:tap + 1, :]
    o_ref[...] = acc.astype(o_ref.dtype)


# ----------------------------------------------------------------------------
# module-level wrapper (matches _DenseLayer.forward, eval mode, drop_rate = 0)
# ----------------------------------------------------------------------------
def dense_layer_forward(params, *prev_features):
    x = jnp.concatenate(prev_features, axis=1)                 # NCHW concat (torch.cat(inputs, 1))
    N, Cin, H, W = x.shape
    hw = H * W

    s1, b1, s2, b2, w1t, w2t = _fold_params(params)
    Cmid = w1t.shape[0]
    G = w2t.shape[0] // 9

    x3 = x.reshape(N, Cin, hw).astype(jnp.float32)             # free reshape, stays NCHW-ordered
    masks = _tap_masks(H, W)

    kernel = functools.partial(_dense_layer_kernel, H, W)
    out3 = pl.pallas_call(
        kernel,
        out_shape=jax.ShapeDtypeStruct((N, G, hw), jnp.float32),
        grid=(N,),
        in_specs=[
            pl.BlockSpec((None, Cin, hw), lambda n: (n, 0, 0)),    # per-image activation tile
            pl.BlockSpec((Cmid, Cin), lambda n: (0, 0)),           # resident weights / folds
            pl.BlockSpec((Cin, 1), lambda n: (0, 0)),
            pl.BlockSpec((Cin, 1), lambda n: (0, 0)),
            pl.BlockSpec((Cmid, 1), lambda n: (0, 0)),
            pl.BlockSpec((Cmid, 1), lambda n: (0, 0)),
            pl.BlockSpec((9 * G, Cmid), lambda n: (0, 0)),
            pl.BlockSpec((9, hw), lambda n: (0, 0)),
        ],
        out_specs=pl.BlockSpec((None, G, hw), lambda n: (n, 0, 0)),
        compiler_params=pltpu.CompilerParams(
            dimension_semantics=("parallel",),
            vmem_limit_bytes=32 * 1024 * 1024,
        ),
    )(x3, w1t, s1, b1, s2, b2, w2t, masks)

    return out3.reshape(N, G, H, W)                            # NCHW output, no transpose needed


# ----------------------------------------------------------------------------
# parameter construction (torch-like layout) + pure-JAX reference
# ----------------------------------------------------------------------------
def init_params(key, num_input_features, growth_rate, bn_size):
    cmid = bn_size * growth_rate
    ks = jax.random.split(key, 8)
    return dict(
        norm1_gamma=1.0 + 0.1 * jax.random.normal(ks[0], (num_input_features,), jnp.float32),
        norm1_beta=0.1 * jax.random.normal(ks[1], (num_input_features,), jnp.float32),
        norm1_mean=0.05 * jax.random.normal(ks[2], (num_input_features,), jnp.float32),
        norm1_var=1.0 + 0.1 * jax.random.uniform(ks[3], (num_input_features,), jnp.float32),
        conv1_w=0.1 * jax.random.normal(ks[4], (cmid, num_input_features, 1, 1), jnp.float32),
        norm2_gamma=1.0 + 0.1 * jax.random.normal(ks[5], (cmid,), jnp.float32),
        norm2_beta=0.1 * jax.random.normal(ks[6], (cmid,), jnp.float32),
        norm2_mean=jnp.zeros((cmid,), jnp.float32),
        norm2_var=jnp.ones((cmid,), jnp.float32),
        conv2_w=0.1 * jax.random.normal(ks[7], (growth_rate, cmid, 3, 3), jnp.float32),
    )


def _reference(params, *prev_features, eps=1e-5):
    x = jnp.concatenate(prev_features, axis=1)
    s1 = params["norm1_gamma"] / jnp.sqrt(params["norm1_var"] + eps)
    b1 = params["norm1_beta"] - params["norm1_mean"] * s1
    h = jnp.maximum(x * s1[None, :, None, None] + b1[None, :, None, None], 0.0)
    bott = jax.lax.conv_general_dilated(
        h, params["conv1_w"], window_strides=(1, 1), padding="VALID",
        dimension_numbers=("NCHW", "OIHW", "NCHW"))
    s2 = params["norm2_gamma"] / jnp.sqrt(params["norm2_var"] + eps)
    b2 = params["norm2_beta"] - params["norm2_mean"] * s2
    bott = jnp.maximum(bott * s2[None, :, None, None] + b2[None, :, None, None], 0.0)
    out = jax.lax.conv_general_dilated(
        bott, params["conv2_w"], window_strides=(1, 1), padding=((1, 1), (1, 1)),
        dimension_numbers=("NCHW", "OIHW", "NCHW"))
    return out


if __name__ == "__main__":
    # _DenseLayer(num_input_features=8, growth_rate=8, bn_size=4, drop_rate=0)
    num_input_features, growth_rate, bn_size = 8, 8, 4
    key = jax.random.PRNGKey(0)
    kp, kx1, kx2 = jax.random.split(key, 3)
    params = init_params(kp, num_input_features, growth_rate, bn_size)

    # two previous feature maps, each (N=2, C=4, H=16, W=16), concat -> 8 channels
    f0 = jax.random.normal(kx1, (2, 4, 16, 16), jnp.float32)
    f1 = jax.random.normal(kx2, (2, 4, 16, 16), jnp.float32)

    out = jax.block_until_ready(dense_layer_forward(params, f0, f1))
    ref = jax.block_until_ready(_reference(params, f0, f1))

    assert out.shape == (2, growth_rate, 16, 16), out.shape
    err = float(jnp.max(jnp.abs(out - ref)))
    assert err < 2e-4, err

    print("KERNEL_OK")
</pallas_src>

<mosaic_0001>
module attributes {stable_mosaic.version = 11 : i64} {
  func.func @_dense_layer_kernel(%arg0: i32, %arg1: memref<1x8x256xf32, #tpu.memory_space<vmem>>, %arg2: memref<32x8xf32, #tpu.memory_space<vmem>>, %arg3: memref<8x1xf32, #tpu.memory_space<vmem>>, %arg4: memref<8x1xf32, #tpu.memory_space<vmem>>, %arg5: memref<32x1xf32, #tpu.memory_space<vmem>>, %arg6: memref<32x1xf32, #tpu.memory_space<vmem>>, %arg7: memref<72x32xf32, #tpu.memory_space<vmem>>, %arg8: memref<9x256xf32, #tpu.memory_space<vmem>>, %arg9: memref<1x8x256xf32, #tpu.memory_space<vmem>>) attributes {dimension_semantics = [#tpu.dimension_semantics<parallel>], iteration_bounds = array<i64: 2>, scalar_prefetch = 0 : i64, scratch_operands = 0 : i64, tpu.core_type = #tpu.core_type<tc>, window_params = [{transform_indices = @transform_0, window_bounds = array<i64: 1, 8, 256>}, {pipeline_mode = #tpu.pipeline_mode<synchronous>, transform_indices = @transform_1, window_bounds = array<i64: 32, 8>}, {pipeline_mode = #tpu.pipeline_mode<synchronous>, transform_indices = @transform_2, window_bounds = array<i64: 8, 1>}, {pipeline_mode = #tpu.pipeline_mode<synchronous>, transform_indices = @transform_3, window_bounds = array<i64: 8, 1>}, {pipeline_mode = #tpu.pipeline_mode<synchronous>, transform_indices = @transform_4, window_bounds = array<i64: 32, 1>}, {pipeline_mode = #tpu.pipeline_mode<synchronous>, transform_indices = @transform_5, window_bounds = array<i64: 32, 1>}, {pipeline_mode = #tpu.pipeline_mode<synchronous>, transform_indices = @transform_6, window_bounds = array<i64: 72, 32>}, {pipeline_mode = #tpu.pipeline_mode<synchronous>, transform_indices = @transform_7, window_bounds = array<i64: 9, 256>}, {transform_indices = @transform_8, window_bounds = array<i64: 1, 8, 256>}]} {
    %c0 = arith.constant 0 : index
    %c0_0 = arith.constant 0 : index
    %c0_1 = arith.constant 0 : index
    %0 = vector.load %arg1[%c0, %c0_0, %c0_1] : memref<1x8x256xf32, #tpu.memory_space<vmem>>, vector<1x8x256xf32>
    %1 = vector.shape_cast %0 : vector<1x8x256xf32> to vector<8x256xf32>
    %c0_2 = arith.constant 0 : index
    %c0_3 = arith.constant 0 : index
    %2 = vector.load %arg3[%c0_2, %c0_3] : memref<8x1xf32, #tpu.memory_space<vmem>>, vector<8x1xf32>
    %3 = vector.broadcast %2 : vector<8x1xf32> to vector<8x256xf32>
    %4 = arith.mulf %1, %3 : vector<8x256xf32>
    %c0_4 = arith.constant 0 : index
    %c0_5 = arith.constant 0 : index
    %5 = vector.load %arg4[%c0_4, %c0_5] : memref<8x1xf32, #tpu.memory_space<vmem>>, vector<8x1xf32>
    %6 = vector.broadcast %5 : vector<8x1xf32> to vector<8x256xf32>
    %7 = arith.addf %4, %6 : vector<8x256xf32>
    %cst = arith.constant 0.000000e+00 : f32
    %8 = vector.broadcast %cst : f32 to vector<8x256xf32>
    %9 = arith.maximumf %7, %8 : vector<8x256xf32>
    %c0_6 = arith.constant 0 : index
    %c0_7 = arith.constant 0 : index
    %10 = vector.load %arg2[%c0_6, %c0_7] : memref<32x8xf32, #tpu.memory_space<vmem>>, vector<32x8xf32>
    %cst_8 = arith.constant dense<0.000000e+00> : vector<32x256xf32>
    %11 = tpu.matmul %10, %9, %cst_8 {dimension_numbers = #tpu.dot_dimension_numbers<[1], [0], [0], [1], [0, 0, 1, 1], [], []>} : vector<32x8xf32>, vector<8x256xf32>, vector<32x256xf32> -> vector<32x256xf32>
    %c0_9 = arith.constant 0 : index
    %c0_10 = arith.constant 0 : index
    %12 = vector.load %arg5[%c0_9, %c0_10] : memref<32x1xf32, #tpu.memory_space<vmem>>, vector<32x1xf32>
    %13 = vector.broadcast %12 : vector<32x1xf32> to vector<32x256xf32>
    %14 = arith.mulf %11, %13 : vector<32x256xf32>
    %c0_11 = arith.constant 0 : index
    %c0_12 = arith.constant 0 : index
    %15 = vector.load %arg6[%c0_11, %c0_12] : memref<32x1xf32, #tpu.memory_space<vmem>>, vector<32x1xf32>
    %16 = vector.broadcast %15 : vector<32x1xf32> to vector<32x256xf32>
    %17 = arith.addf %14, %16 : vector<32x256xf32>
    %cst_13 = arith.constant 0.000000e+00 : f32
    %18 = vector.broadcast %cst_13 : f32 to vector<32x256xf32>
    %19 = arith.maximumf %17, %18 : vector<32x256xf32>
    %c0_14 = arith.constant 0 : index
    %c0_15 = arith.constant 0 : index
    %20 = vector.load %arg7[%c0_14, %c0_15] : memref<72x32xf32, #tpu.memory_space<vmem>>, vector<72x32xf32>
    %cst_16 = arith.constant dense<0.000000e+00> : vector<72x256xf32>
    %21 = tpu.matmul %20, %19, %cst_16 {dimension_numbers = #tpu.dot_dimension_numbers<[1], [0], [0], [1], [0, 0, 1, 1], [], []>} : vector<72x32xf32>, vector<32x256xf32>, vector<72x256xf32> -> vector<72x256xf32>
    %c0_17 = arith.constant 0 : index
    %c0_18 = arith.constant 0 : index
    %22 = vector.load %arg8[%c0_17, %c0_18] : memref<9x256xf32, #tpu.memory_space<vmem>>, vector<9x256xf32>
    %cst_19 = arith.constant 0.000000e+00 : f32
    %23 = vector.broadcast %cst_19 : f32 to vector<8x256xf32>
    %24 = vector.extract_strided_slice %21 {offsets = [0, 0], sizes = [8, 256], strides = [1, 1]} : vector<72x256xf32> to vector<8x256xf32>
    %cst_20 = arith.constant 0.000000e+00 : f32
    %25 = vector.broadcast %cst_20 : f32 to vector<8x17xf32>
    %26 = vector.extract_strided_slice %24 {offsets = [0, 0], sizes = [8, 239], strides = [1, 1]} : vector<8x256xf32> to vector<8x239xf32>
    %27 = tpu.concatenate %25, %26 in 1 : vector<8x17xf32>, vector<8x239xf32> -> vector<8x256xf32>
    %28 = vector.extract_strided_slice %22 {offsets = [0, 0], sizes = [1, 256], strides = [1, 1]} : vector<9x256xf32> to vector<1x256xf32>
    %29 = vector.broadcast %28 : vector<1x256xf32> to vector<8x256xf32>
    %30 = arith.mulf %27, %29 : vector<8x256xf32>
    %31 = arith.addf %23, %30 : vector<8x256xf32>
    %32 = vector.extract_strided_slice %21 {offsets = [8, 0], sizes = [8, 256], strides = [1, 1]} : vector<72x256xf32> to vector<8x256xf32>
    %cst_21 = arith.constant 0.000000e+00 : f32
    %33 = vector.broadcast %cst_21 : f32 to vector<8x16xf32>
    %34 = vector.extract_strided_slice %32 {offsets = [0, 0], sizes = [8, 240], strides = [1, 1]} : vector<8x256xf32> to vector<8x240xf32>
    %35 = tpu.concatenate %33, %34 in 1 : vector<8x16xf32>, vector<8x240xf32> -> vector<8x256xf32>
    %36 = vector.extract_strided_slice %22 {offsets = [1, 0], sizes = [1, 256], strides = [1, 1]} : vector<9x256xf32> to vector<1x256xf32>
    %37 = vector.broadcast %36 : vector<1x256xf32> to vector<8x256xf32>
    %38 = arith.mulf %35, %37 : vector<8x256xf32>
    %39 = arith.addf %31, %38 : vector<8x256xf32>
    %40 = vector.extract_strided_slice %21 {offsets = [16, 0], sizes = [8, 256], strides = [1, 1]} : vector<72x256xf32> to vector<8x256xf32>
    %cst_22 = arith.constant 0.000000e+00 : f32
    %41 = vector.broadcast %cst_22 : f32 to vector<8x15xf32>
    %42 = vector.extract_strided_slice %40 {offsets = [0, 0], sizes = [8, 241], strides = [1, 1]} : vector<8x256xf32> to vector<8x241xf32>
    %43 = tpu.concatenate %41, %42 in 1 : vector<8x15xf32>, vector<8x241xf32> -> vector<8x256xf32>
    %44 = vector.extract_strided_slice %22 {offsets = [2, 0], sizes = [1, 256], strides = [1, 1]} : vector<9x256xf32> to vector<1x256xf32>
    %45 = vector.broadcast %44 : vector<1x256xf32> to vector<8x256xf32>
    %46 = arith.mulf %43, %45 : vector<8x256xf32>
    %47 = arith.addf %39, %46 : vector<8x256xf32>
    %48 = vector.extract_strided_slice %21 {offsets = [24, 0], sizes = [8, 256], strides = [1, 1]} : vector<72x256xf32> to vector<8x256xf32>
    %cst_23 = arith.constant 0.000000e+00 : f32
    %49 = vector.broadcast %cst_23 : f32 to vector<8x1xf32>
    %50 = vector.extract_strided_slice %48 {offsets = [0, 0], sizes = [8, 255], strides = [1, 1]} : vector<8x256xf32> to vector<8x255xf32>
    %51 = tpu.concatenate %49, %50 in 1 : vector<8x1xf32>, vector<8x255xf32> -> vector<8x256xf32>
    %52 = vector.extract_strided_slice %22 {offsets = [3, 0], sizes = [1, 256], strides = [1, 1]} : vector<9x256xf32> to vector<1x256xf32>
    %53 = vector.broadcast %52 : vector<1x256xf32> to vector<8x256xf32>
    %54 = arith.mulf %51, %53 : vector<8x256xf32>
    %55 = arith.addf %47, %54 : vector<8x256xf32>
    %56 = vector.extract_strided_slice %21 {offsets = [32, 0], sizes = [8, 256], strides = [1, 1]} : vector<72x256xf32> to vector<8x256xf32>
    %57 = vector.extract_strided_slice %22 {offsets = [4, 0], sizes = [1, 256], strides = [1, 1]} : vector<9x256xf32> to vector<1x256xf32>
    %58 = vector.broadcast %57 : vector<1x256xf32> to vector<8x256xf32>
    %59 = arith.mulf %56, %58 : vector<8x256xf32>
    %60 = arith.addf %55, %59 : vector<8x256xf32>
    %61 = vector.extract_strided_slice %21 {offsets = [40, 0], sizes = [8, 256], strides = [1, 1]} : vector<72x256xf32> to vector<8x256xf32>
    %cst_24 = arith.constant 0.000000e+00 : f32
    %62 = vector.broadcast %cst_24 : f32 to vector<8x1xf32>
    %63 = vector.extract_strided_slice %61 {offsets = [0, 1], sizes = [8, 255], strides = [1, 1]} : vector<8x256xf32> to vector<8x255xf32>
    %64 = tpu.concatenate %63, %62 in 1 : vector<8x255xf32>, vector<8x1xf32> -> vector<8x256xf32>
    %65 = vector.extract_strided_slice %22 {offsets = [5, 0], sizes = [1, 256], strides = [1, 1]} : vector<9x256xf32> to vector<1x256xf32>
    %66 = vector.broadcast %65 : vector<1x256xf32> to vector<8x256xf32>
    %67 = arith.mulf %64, %66 : vector<8x256xf32>
    %68 = arith.addf %60, %67 : vector<8x256xf32>
    %69 = vector.extract_strided_slice %21 {offsets = [48, 0], sizes = [8, 256], strides = [1, 1]} : vector<72x256xf32> to vector<8x256xf32>
    %cst_25 = arith.constant 0.000000e+00 : f32
    %70 = vector.broadcast %cst_25 : f32 to vector<8x15xf32>
    %71 = vector.extract_strided_slice %69 {offsets = [0, 15], sizes = [8, 241], strides = [1, 1]} : vector<8x256xf32> to vector<8x241xf32>
    %72 = tpu.concatenate %71, %70 in 1 : vector<8x241xf32>, vector<8x15xf32> -> vector<8x256xf32>
    %73 = vector.extract_strided_slice %22 {offsets = [6, 0], sizes = [1, 256], strides = [1, 1]} : vector<9x256xf32> to vector<1x256xf32>
    %74 = vector.broadcast %73 : vector<1x256xf32> to vector<8x256xf32>
    %75 = arith.mulf %72, %74 : vector<8x256xf32>
    %76 = arith.addf %68, %75 : vector<8x256xf32>
    %77 = vector.extract_strided_slice %21 {offsets = [56, 0], sizes = [8, 256], strides = [1, 1]} : vector<72x256xf32> to vector<8x256xf32>
    %cst_26 = arith.constant 0.000000e+00 : f32
    %78 = vector.broadcast %cst_26 : f32 to vector<8x16xf32>
    %79 = vector.extract_strided_slice %77 {offsets = [0, 16], sizes = [8, 240], strides = [1, 1]} : vector<8x256xf32> to vector<8x240xf32>
    %80 = tpu.concatenate %79, %78 in 1 : vector<8x240xf32>, vector<8x16xf32> -> vector<8x256xf32>
    %81 = vector.extract_strided_slice %22 {offsets = [7, 0], sizes = [1, 256], strides = [1, 1]} : vector<9x256xf32> to vector<1x256xf32>
    %82 = vector.broadcast %81 : vector<1x256xf32> to vector<8x256xf32>
    %83 = arith.mulf %80, %82 : vector<8x256xf32>
    %84 = arith.addf %76, %83 : vector<8x256xf32>
    %85 = vector.extract_strided_slice %21 {offsets = [64, 0], sizes = [8, 256], strides = [1, 1]} : vector<72x256xf32> to vector<8x256xf32>
    %cst_27 = arith.constant 0.000000e+00 : f32
    %86 = vector.broadcast %cst_27 : f32 to vector<8x17xf32>
    %87 = vector.extract_strided_slice %85 {offsets = [0, 17], sizes = [8, 239], strides = [1, 1]} : vector<8x256xf32> to vector<8x239xf32>
    %88 = tpu.concatenate %87, %86 in 1 : vector<8x239xf32>, vector<8x17xf32> -> vector<8x256xf32>
    %89 = vector.extract_strided_slice %22 {offsets = [8, 0], sizes = [1, 256], strides = [1, 1]} : vector<9x256xf32> to vector<1x256xf32>
    %90 = vector.broadcast %89 : vector<1x256xf32> to vector<8x256xf32>
    %91 = arith.mulf %88, %90 : vector<8x256xf32>
    %92 = arith.addf %84, %91 : vector<8x256xf32>
    %c0_28 = arith.constant 0 : index
    %c0_29 = arith.constant 0 : index
    %c0_30 = arith.constant 0 : index
    %93 = vector.load %arg9[%c0_28, %c0_29, %c0_30] : memref<1x8x256xf32, #tpu.memory_space<vmem>>, vector<1x8x256xf32>
    %94 = vector.shape_cast %93 : vector<1x8x256xf32> to vector<8x256xf32>
    %95 = vector.shape_cast %92 : vector<8x256xf32> to vector<1x8x256xf32>
    tpu.vector_store %arg9[%c0_28, %c0_29, %c0_30], %95 {strides = array<i32>} : memref<1x8x256xf32, #tpu.memory_space<vmem>>, vector<1x8x256xf32>,
    return
  }
  func.func @transform_0(%arg0: i32) -> (i32, i32, i32) {
    %c0_i32 = arith.constant 0 : i32
    %c0_i32_0 = arith.constant 0 : i32
    %c0_i32_1 = arith.constant 0 : i32
    return %arg0, %c0_i32, %c0_i32_0 : i32, i32, i32
  }
  func.func @transform_1(%arg0: i32) -> (i32, i32) {
    %c0_i32 = arith.constant 0 : i32
    %c0_i32_0 = arith.constant 0 : i32
    %c0_i32_1 = arith.constant 0 : i32
    return %c0_i32, %c0_i32_0 : i32, i32
  }
  func.func @transform_2(%arg0: i32) -> (i32, i32) {
    %c0_i32 = arith.constant 0 : i32
    %c0_i32_0 = arith.constant 0 : i32
    %c0_i32_1 = arith.constant 0 : i32
    return %c0_i32, %c0_i32_0 : i32, i32
  }
  func.func @transform_3(%arg0: i32) -> (i32, i32) {
    %c0_i32 = arith.constant 0 : i32
    %c0_i32_0 = arith.constant 0 : i32
    %c0_i32_1 = arith.constant 0 : i32
    return %c0_i32, %c0_i32_0 : i32, i32
  }
  func.func @transform_4(%arg0: i32) -> (i32, i32) {
    %c0_i32 = arith.constant 0 : i32
    %c0_i32_0 = arith.constant 0 : i32
    %c0_i32_1 = arith.constant 0 : i32
    return %c0_i32, %c0_i32_0 : i32, i32
  }
  func.func @transform_5(%arg0: i32) -> (i32, i32) {
    %c0_i32 = arith.constant 0 : i32
    %c0_i32_0 = arith.constant 0 : i32
    %c0_i32_1 = arith.constant 0 : i32
    return %c0_i32, %c0_i32_0 : i32, i32
  }
  func.func @transform_6(%arg0: i32) -> (i32, i32) {
    %c0_i32 = arith.constant 0 : i32
    %c0_i32_0 = arith.constant 0 : i32
    %c0_i32_1 = arith.constant 0 : i32
    return %c0_i32, %c0_i32_0 : i32, i32
  }
  func.func @transform_7(%arg0: i32) -> (i32, i32) {
    %c0_i32 = arith.constant 0 : i32
    %c0_i32_0 = arith.constant 0 : i32
    %c0_i32_1 = arith.constant 0 : i32
    return %c0_i32, %c0_i32_0 : i32, i32
  }
  func.func @transform_8(%arg0: i32) -> (i32, i32, i32) {
    %c0_i32 = arith.constant 0 : i32
    %c0_i32_0 = arith.constant 0 : i32
    %c0_i32_1 = arith.constant 0 : i32
    return %arg0, %c0_i32, %c0_i32_0 : i32, i32, i32
  }
}

</mosaic_0001>

<bundles_post_ra>
// kernel: tpu_custom_call.1
= control target key start
LH: loop header
LB: loop body
LE: loop exit
PB: predicated region body
PF: predicated region fallthrough
CT: control target
= control target key end

     0   :  { %13 = vsyncpa [#allocation3], 0  ;;  %s1382_s0 = inlined_call_operand.vmem [shape: f32[2,8,256], index: 0, kind: input, shape index: {}]   ;;  %s1383_s1 = inlined_call_operand.vmem [shape: f32[32,8], index: 1, kind: input, shape index: {}]   ;;  %s1384_s2 = inlined_call_operand.vmem [shape: f32[8,1], index: 2, kind: input, shape index: {}]   ;;  %s1385_s3 = inlined_call_operand.vmem [shape: f32[8,1], index: 3, kind: input, shape index: {}]   ;;  %s1386_s4 = inlined_call_operand.vmem [shape: f32[32,1], index: 4, kind: input, shape index: {}]   ;;  %s1387_s5 = inlined_call_operand.vmem [shape: f32[32,1], index: 5, kind: input, shape index: {}]   ;;  %s1388_s6 = inlined_call_operand.vmem [shape: f32[72,32], index: 6, kind: input, shape index: {}]   ;;  %s1389_s7 = inlined_call_operand.vmem [shape: f32[9,256], index: 7, kind: input, shape index: {}]   ;;  %s1390_s8 = inlined_call_operand.hbm [shape: f32[2,8,256], index: 8, kind: output, shape index: {}]  }
   0x1   :  { %15 = vsyncpa [#allocation3 + $0x1], 0  ;;  %s1140_s27 = smov 0   ;;  %s1142_s28 = smov 0  }
   0x2   :  { %s1144_s29 = smov 0   ;;  %s1146_s30 = smov 0  }
   0x3 LB: > { %s1161_s9 = sadd.s32 4294967295, %s1082_s30   ;;  %s934_s10 = sadd.s32 4294967294, %s1082_s30   ;;  %s1082_s30 = sphi %s1146_s30, %s1396_s30   ;;  %s1078_s29 = sphi %s1144_s29, %s1395_s29   ;;  %s1074_s28 = sphi %s1142_s28, %s1394_s28   ;;  %s1070_s27 = sphi %s1140_s27, %s1393_s27  }
   0x4   : > { %s1165_s11 = sadd.s32 1, %s1082_s30   ;;  %s201_s12 = sadd.s32 1, %s1078_s29 }
   0x5   : > { %s198_s13 = ssub.s32 %s1082_s30, %s1165_s11  ;;  %p211_p0 = scmp.ne.s32.totalorder %s1078_s29, %s1074_s28 }
   0x6   : > { %p199_p1 = scmp.eq.s32.totalorder %s198_s13, 0  ;;  %p212_p2 = scmp.eq.s32.totalorder %s1161_s9, 1 }
   0x7   : > { %p217_p3 = scmp.ne.s32.totalorder %s1074_s28, %s1070_s27  ;;  %p218_p4 = scmp.eq.s32.totalorder %s934_s10, 1 }
   0x8   : > { %s1176_s14 = scalar_select %p199_p1, %s1078_s29, %s201_s12  }
   0x9   : > { %p1178_p5 = por %p212_p2, %p211_p0  ;;  %p1182_p6 = por %p218_p4, %p217_p3 }
   0xa   : > { %p937_p7 = scmp.ge.s32.totalorder %s1082_s30, 1  ;;  %p265_p8 = scmp.lt.s32.totalorder %s1082_s30, 3 }
   0xc   : > { %p266_p9 = pnand %p937_p7, %p265_p8 }
   0xd   : > { %p299_p10 = scmp.lt.s32.totalorder (!%p266_p9), %s1161_s9, 1  ;;  %s1086_s13 = smov (!%p266_p9), 17  }
   0xe   : > { %269 = sbr.rel (%p266_p9) target bundleno = 732 (0x2dc), region = 52  ;;  %s1087_s17 = smov (!%p266_p9), 1  }
   0xf   : > { %s1088_s18 = smov (!%p266_p9), 16   ;;  %s1089_s19 = smov (!%p266_p9), 15  }
  0x10   : > { %s1090_s20 = smov (!%p266_p9), 127   ;;  %s1091_s21 = smov (!%p266_p9), 113  }
  0x11   : > { %s1092_s22 = smov (!%p266_p9), 112   ;;  %s1093_s23 = smov (!%p266_p9), 111  }
  0x13   : > { %v306_v0 = vld [vmem:[%s1384_s2] sm:$0xff]  ;;  %v1084_v1 = vmov 0   ;;  %v465_v3 = vld [vmem:[%s1387_s5 + $0x18] sm:$0xff]  ;;  %v1085_v4 = vmov 0.0   ;;  %v464_v5 = vld [vmem:[%s1387_s5 + $0x10] sm:$0xff]  ;;  %s300_s24 = scalar_select %p299_p10, %s1161_s9, 1 }
  0x14   : > { %1020 = vset.pattern.permute.xlu0 %v1084_v1  ;;  %1021 = vset.pattern.permute.xlu1 %v1084_v1  ;;  %v314_v2 = vld [vmem:[%s1385_s3] sm:$0xff]  ;;  %v463_v6 = vld [vmem:[%s1387_s5 + $0x8] sm:$0xff]  ;;  %v433_v7 = vld [vmem:[%s1386_s4 + $0x18] sm:$0xff]  ;;  %vm328_vm0 = vcmask 64512   ;;  %vm511_vm1 = vcmask 261120   ;;  %vm668_vm2 = vcmask 138240  }
  0x15   : > { %309 = vperm.xlu0 %1020, %v306_v0   ;;  %405 = vmatprep.mubr.f32.mxu0 %v1085_v4  ;;  %v432_v8 = vld [vmem:[%s1386_s4 + $0x10] sm:$0xff]  ;;  %v431_v9 = vld [vmem:[%s1386_s4 + $0x8] sm:$0xff]  ;;  %v430_v10 = vld [vmem:[%s1386_s4] sm:$0xff]  ;;  %s961_s25 = sshll.u32 %s300_s24, 4  ;;  %vm691_vm3 = vcmask 130048   ;;  %vm714_vm4 = vcmask 121856  }
  0x16   : > { %621 = vmatprep.mubr.f32.mxu1 %v1085_v4  ;;  %451 = vperm.xlu1 %1021, %v433_v7   ;;  %v462_v11 = vld [vmem:[%s1387_s5] sm:$0xff]  ;;  %s303_s12 = scalar_lea.vmem %s1382_s0, %s961_s25  ;;  %v325_v23 = vld [vmem:[%s1383_s1 + $0x8] sm:$0xff]  ;;  %v326_v24 = vld [vmem:[%s1383_s1 + $0x10] sm:$0xff]  ;;  %vm737_vm5 = vcmask 7168   ;;  %vm772_vm6 = vcmask 1039360   ;;  %vm795_vm7 = vcmask 924672  }
  0x17   : > { %v304_v13 = vld [vmem:[%s303_s12] sm:$0xff]  ;;  %v305_v14 = vld [vmem:[%s303_s12 + $0x8] sm:$0xff]  ;;  %v327_v25 = vld [vmem:[%s1383_s1 + $0x18] sm:$0xff]  ;;  %s296_s12 = sand.u32 1, %s1074_s28   ;;  %vm818_vm8 = vcmask 916480   ;;  %vm841_vm9 = vcmask 908288  }
  0x18   : > { %v324_v22 = vld [vmem:[%s1383_s1] sm:$0xff]  ;;  %v504_v7 = vld [vmem:[%s1388_s6 + $0x10] sm:$0xff]  ;;  %s861_s10 = scalar_lea.sflag [#allocation3], %s296_s12 }
  0x19   : > { %317 = vperm.xlu0 %1020, %v314_v2   ;;  %v502_v2 = vld [vmem:[%s1388_s6] sm:$0xff] }
  0x1a   : > { %446 = vperm.xlu1 %1021, %v432_v8   ;;  %v507_v8 = vld [vmem:[%s1388_s6 + $0x28] sm:$0xff] }
  0x1d   : > { %483 = vperm.xlu0 %1020, %v465_v3   ;;  %v505_v3 = vld [vmem:[%s1388_s6 + $0x18] sm:$0xff] }
  0x1e   : > { %441 = vperm.xlu1 %1021, %v431_v9   ;;  %v508_v9 = vld [vmem:[%s1388_s6 + $0x30] sm:$0xff] }
  0x21   : > { %478 = vperm.xlu0 %1020, %v464_v5   ;;  %v503_v5 = vld [vmem:[%s1388_s6 + $0x8] sm:$0xff] }
  0x22   : > { %436 = vperm.xlu1 %1021, %v430_v10   ;;  %v509_v10 = vld [vmem:[%s1388_s6 + $0x38] sm:$0xff] }
  0x25   : > { %473 = vperm.xlu0 %1020, %v463_v6   ;;  %v506_v6 = vld [vmem:[%s1388_s6 + $0x20] sm:$0xff] }
  0x26   : > { %468 = vperm.xlu1 %1021, %v462_v11   ;;  %v510_v11 = vld [vmem:[%s1388_s6 + $0x40] sm:$0xff] }
  0x90   : > { %v310_v12 = vpop.permute.xlu0 %309 }
  0x91   : > { %v312_v15 = vmul.f32 %v310_v12, %v304_v13  ;;  %v313_v16 = vmul.f32 %v310_v12, %v305_v14  ;;  %v452_v26 = vpop.permute.xlu1 %451 }
  0x94   : > { %v318_v17 = vpop.permute.xlu0 %317 }
  0x95   : > { %v320_v18 = vadd.f32 %v318_v17, %v312_v15  ;;  %v321_v19 = vadd.f32 %v318_v17, %v313_v16  ;;  %v447_v28 = vpop.permute.xlu1 %446 }
  0x97   : > { %v323_v20 = vmax.f32 %v321_v19, 0.0  ;;  %v322_v21 = vmax.f32 %v320_v18, 0.0 }
  0x98   : > { %v484_v31 = vpop.permute.xlu0 %483 }
  0x99   : > { %371 = vmatprep.subr.mxu0 %v323_v20  ;;  %v442_v33 = vpop.permute.xlu1 %441 }
  0x9a   : > { %372 = vmatpush1.msra.mxu0 %v322_v21 }
  0x9b   : > { %941 = vmatmul.mubr.msk.f32.vlgmr.msra.gmra.mxu0 %vm328_vm0, %v324_v22 }
  0x9c   : > { %411 = vmatprep.mubr.f32.mxu0 %v1085_v4  ;;  %v479_v36 = vpop.permute.xlu0 %478 }
  0x9d   : > { %v437_v38 = vpop.permute.xlu1 %436 }
  0x9f   : > { %942 = vmatmul.mubr.msk.f32.gmra.mxu0 %vm328_vm0, %v325_v23 }
  0xa0   : > { %417 = vmatprep.mubr.f32.mxu0 %v1085_v4  ;;  %v474_v50 = vpop.permute.xlu0 %473 }
  0xa1   : > { %v469_v53 = vpop.permute.xlu1 %468 }
  0xa3   : > { %943 = vmatmul.mubr.msk.f32.gmra.mxu0 %vm328_vm0, %v326_v24 }
  0xa4   : > { %423 = vmatprep.mubr.f32.mxu0 %v1085_v4 }
  0xa7   : > { %944 = vmatmul.mubr.msk.f32.gmra.mxu0 %vm328_vm0, %v327_v25 }
  0xa8   : > { %603 = vmatprep.mubr.f32.mxu0 %v1085_v4 }
 0x15b   : > { %v407_v27 = vpop.f32.mrf.mxu0 }
 0x15c   : > { %v454_v51 = vmul.f32 %v437_v38, %v407_v27 }
 0x15d   : > { %v409_v29 = vpop.f32.mrf.mxu0 }
 0x15e   : > { %v455_v47 = vmul.f32 %v437_v38, %v409_v29  ;;  %v486_v60 = vadd.f32 %v469_v53, %v454_v51  ;;  %v673_v29 = vlaneseq }
 0x15f   : > { %v413_v30 = vpop.f32.mrf.mxu0 }
 0x160   : > { %v456_v45 = vmul.f32 %v442_v33, %v413_v30  ;;  %v487_v58 = vadd.f32 %v469_v53, %v455_v47  ;;  %v494_v1 = vmax.f32 %v486_v60, 0.0  ;;  %v1288_v30 = vshrl.u32 %v673_v29, 7 }
 0x161   : > { %v415_v32 = vpop.f32.mrf.mxu0 }
 0x162   : > { %v457_v43 = vmul.f32 %v442_v33, %v415_v32  ;;  %v488_v56 = vadd.f32 %v474_v50, %v456_v45  ;;  %v495_v0 = vmax.f32 %v487_v58, 0.0  ;;  %v698_v33 = vsub.s32 1, %v1288_v30 }
 0x163   : > { %v419_v34 = vpop.f32.mrf.mxu0  ;;  %v744_v45 = vsub.s32 3, %v1288_v30  ;;  %v756_v51 = vsub.s32 4, %v1288_v30 }
 0x164   : > { %v458_v41 = vmul.f32 %v447_v28, %v419_v34  ;;  %v489_v54 = vadd.f32 %v474_v50, %v457_v43  ;;  %v496_v63 = vmax.f32 %v488_v56, 0.0  ;;  %v675_v34 = vsub.s32 0, %v1288_v30 }
 0x165   : > { %v421_v35 = vpop.f32.mrf.mxu0 }
 0x166   : > { %v459_v39 = vmul.f32 %v447_v28, %v421_v35  ;;  %v490_v52 = vadd.f32 %v479_v36, %v458_v41  ;;  %v497_v62 = vmax.f32 %v489_v54, 0.0 }
 0x167   : > { %v425_v37 = vpop.f32.mrf.mxu0 }
 0x168   : > { %v460_v40 = vmul.f32 %v452_v26, %v425_v37  ;;  %v491_v48 = vadd.f32 %v479_v36, %v459_v39  ;;  %v498_v61 = vmax.f32 %v490_v52, 0.0  ;;  %v1295_v36 = vld [vmem:[%s1389_s7] sm:$0xff]  ;;  %v721_v39 = vsub.s32 2, %v1288_v30 }
 0x169   : > { %v427_v42 = vpop.f32.mrf.mxu0  ;;  %v699_v38 = vrot.slane %v1295_v36, %v698_v33  ;;  %v676_v41 = vrot.slane %v1295_v36, %v675_v34  ;;  %v745_v58 = vrot.slane %v1295_v36, %v744_v45 }
 0x16a   : > { %v461_v44 = vmul.f32 %v452_v26, %v427_v42  ;;  %v492_v46 = vadd.f32 %v484_v31, %v460_v40  ;;  %v499_v59 = vmax.f32 %v491_v48, 0.0  ;;  %v1302_v40 = vld [vmem:[%s1389_s7 + $0x8] sm:$0xff]  ;;  %v722_v50 = vrot.slane %v1295_v36, %v721_v39 }
 0x16b   : > { %v703_v43 = vrot.slane %v1302_v40, %v698_v33  ;;  %v680_v47 = vrot.slane %v1302_v40, %v675_v34 }
 0x16c   : > { %v493_v49 = vadd.f32 %v484_v31, %v461_v44  ;;  %v500_v57 = vmax.f32 %v492_v46, 0.0 }
 0x16e   : > { %v501_v55 = vmax.f32 %v493_v49, 0.0 }
 0x170   : > { %563 = vmatprep.subr.mxu0 %v501_v55  ;;  %963 = vmatprep.subr.mxu1 %v501_v55 }
 0x171   : > { %564 = vmatpush1.msra.mxu0 %v500_v57  ;;  %967 = vmatpush1.msra.mxu1 %v500_v57  ;;  %v726_v57 = vrot.slane %v1302_v40, %v721_v39 }
 0x172   : > { %565 = vmatprep.subr.mxu0 %v499_v59  ;;  %964 = vmatprep.subr.mxu1 %v499_v59 }
 0x173   : > { %566 = vmatpush1.msra.mxu0 %v498_v61  ;;  %968 = vmatpush1.msra.mxu1 %v498_v61  ;;  %v749_v61 = vrot.slane %v1302_v40, %v744_v45 }
 0x174   : > { %567 = vmatprep.subr.mxu0 %v497_v62  ;;  %965 = vmatprep.subr.mxu1 %v497_v62 }
 0x175   : > { %568 = vmatpush1.msra.mxu0 %v496_v63  ;;  %969 = vmatpush1.msra.mxu1 %v496_v63 }
 0x176   : > { %569 = vmatprep.subr.mxu0 %v495_v0  ;;  %966 = vmatprep.subr.mxu1 %v495_v0 }
 0x177   : > { %570 = vmatpush1.msra.mxu0 %v494_v1  ;;  %970 = vmatpush1.msra.mxu1 %v494_v1 }
 0x178   : > { %945 = vmatmul.mubr.msk.f32.vlgmr.msra.gmra.mxu0 %vm511_vm1, %v502_v2  ;;  %948 = vmatmul.mubr.msk.f32.vlgmr.msra.gmra.mxu1 %vm511_vm1, %v505_v3 }
 0x179   : > { %609 = vmatprep.mubr.f32.mxu0 %v1085_v4  ;;  %627 = vmatprep.mubr.f32.mxu1 %v1085_v4 }
 0x17c   : > { %946 = vmatmul.mubr.msk.f32.gmra.mxu0 %vm511_vm1, %v503_v5  ;;  %949 = vmatmul.mubr.msk.f32.gmra.mxu1 %vm511_vm1, %v506_v6  ;;  %v779_v5 = vsub.s32 5, %v1288_v30  ;;  %v761_v6 = vrot.slane %v1302_v40, %v756_v51 }
 0x17d   : > { %615 = vmatprep.mubr.f32.mxu0 %v1085_v4  ;;  %633 = vmatprep.mubr.f32.mxu1 %v1085_v4 }
 0x180   : > { %947 = vmatmul.mubr.msk.f32.gmra.mxu0 %vm511_vm1, %v504_v7  ;;  %950 = vmatmul.mubr.msk.f32.gmra.mxu1 %vm511_vm1, %v507_v8 }
 0x181   : > { %639 = vmatprep.mubr.f32.mxu1 %v1085_v4 }
 0x184   : > { %951 = vmatmul.mubr.msk.f32.gmra.mxu1 %vm511_vm1, %v508_v9 }
 0x185   : > { %645 = vmatprep.mubr.f32.mxu1 %v1085_v4 }
 0x188   : > { %952 = vmatmul.mubr.msk.f32.gmra.mxu1 %vm511_vm1, %v509_v10 }
 0x189   : > { %651 = vmatprep.mubr.f32.mxu1 %v1085_v4 }
 0x18c   : > { %953 = vmatmul.mubr.msk.f32.gmra.mxu1 %vm511_vm1, %v510_v11  ;;  %v757_v11 = vrot.slane %v1295_v36, %v756_v51 }
 0x238   : > { %v605_v12 = vpop.f32.mrf.mxu0  ;;  %v623_v13 = vpop.f32.mrf.mxu1 }
 0x239   : > { %664 = vrot.lane.b32.xlu0 %v605_v12, %s1086_s13 }
 0x23a   : > { %v607_v14 = vpop.f32.mrf.mxu0  ;;  %v625_v15 = vpop.f32.mrf.mxu1 }
 0x23b   : > { %666 = vrot.lane.b32.xlu1 %v607_v14, %s1086_s13  ;;  %s938_s13 = sshll.u32 %s296_s12, 4 }
 0x23c   : > { %v611_v16 = vpop.f32.mrf.mxu0  ;;  %v1284_v17 = vpop.f32.mrf.mxu1 }
 0x23d   : > { %733 = vrot.lane.b32.xlu0 %v623_v13, %s1087_s17 }
 0x23e   : > { %v613_v18 = vpop.f32.mrf.mxu0  ;;  %v1286_v4 = vpop.f32.mrf.mxu1 }
 0x23f   : > { %735 = vrot.lane.b32.xlu1 %v625_v15, %s1087_s17 }
 0x240   : > { %v635_v19 = vpop.f32.mrf.mxu1  ;;  %v617_v20 = vpop.f32.mrf.mxu0 }
 0x241   : > { %687 = vrot.lane.b32.xlu0 %v611_v16, %s1088_s18  ;;  %v802_v16 = vsub.s32 6, %v1288_v30 }
 0x242   : > { %v637_v21 = vpop.f32.mrf.mxu1  ;;  %v619_v23 = vpop.f32.mrf.mxu0 }
 0x243   : > { %689 = vrot.lane.b32.xlu1 %v613_v18, %s1088_s18  ;;  %v780_v18 = vrot.slane %v1295_v36, %v779_v5  ;;  %v803_v29 = vrot.slane %v1295_v36, %v802_v16 }
 0x244   : > { %v641_v22 = vpop.f32.mrf.mxu1 }
 0x245   : > { %710 = vrot.lane.b32.xlu0 %v617_v20, %s1089_s19  ;;  %v825_v20 = vsub.s32 7, %v1288_v30 }
 0x246   : > { %v643_v24 = vpop.f32.mrf.mxu1 }
 0x247   : > { %712 = vrot.lane.b32.xlu1 %v619_v23, %s1089_s19  ;;  %v830_v39 = vrot.slane %v1302_v40, %v825_v20 }
 0x248   : > { %v647_v25 = vpop.f32.mrf.mxu1 }
 0x249   : > { %768 = vrot.lane.b32.xlu0 %v635_v19, %s1090_s20  ;;  %v784_v19 = vrot.slane %v1302_v40, %v779_v5 }
 0x24a   : > { %v649_v26 = vpop.f32.mrf.mxu1 }
 0x24b   : > { %770 = vrot.lane.b32.xlu1 %v637_v21, %s1090_s20  ;;  %v763_v21 = vmul.f32 %v761_v6, %v1286_v4  ;;  %v826_v4 = vrot.slane %v1295_v36, %v825_v20  ;;  %v954_v36 = vld [vmem:[%s1389_s7 + $0x10] ss:$0 sm:$0xff] }
 0x24c   : > { %v653_v27 = vpop.f32.mrf.mxu1 }
 0x24d   : > { %791 = vrot.lane.b32.xlu0 %v641_v22, %s1091_s21 }
 0x24e   : > { %v655_v28 = vpop.f32.mrf.mxu1 }
 0x24f   : > { %793 = vrot.lane.b32.xlu1 %v643_v24, %s1091_s21  ;;  %s962_s21 = sshll.u32 %s1161_s9, 8 }
 0x250   : > { %s1345_s26 = scalar_lea.hbm %s1390_s8, %s962_s21 }
 0x251   : > { %814 = vrot.lane.b32.xlu0 %v647_v25, %s1092_s22 }
 0x253   : > { %816 = vrot.lane.b32.xlu1 %v649_v26, %s1092_s22  ;;  %s298_s22 = scalar_lea.vmem [#allocation2], %s938_s13  ;;  %s1094_s13 = smov [#allocation2]  }
 0x254   : > { %s1026_s17 = sshll.u32 %s1094_s13, 4  ;;  %s1027_s17 = int_to_ptr.vmem [resolvable:$false] %s1026_s17 }
 0x255   : > { %837 = vrot.lane.b32.xlu0 %v653_v27, %s1093_s23  ;;  %v762_v27 = vmul.f32 %v757_v11, %v1284_v17  ;;  %s1028_s18 = scalar_lea.vmem %s1027_s17, 512 }
 0x257   : > { %839 = vrot.lane.b32.xlu1 %v655_v28, %s1093_s23  ;;  %s875_s23 = sshll.u32 %s298_s22, 4  ;;  %s876_s23 = int_to_ptr.vmem [resolvable:$true] %s875_s23 }
 0x258   : > { %s1022_s9 = scalar_lea.vmem %s876_s23, 256  ;;  %p1029_p0 = scmp.lt.s32.totalorder %s876_s23, %s1027_s17 }
 0x259   : > { %p1023_p11 = scmp.ne.s32.totalorder %s876_s23, %s1022_s9  ;;  %p1030_p1 = scmp.lt.s32.totalorder %s1028_s18, %s1022_s9 }
 0x25b   : > { %p1024_p12 = pnand %p1023_p11, %p1178_p5  ;;  %p1031_p2 = por %p1030_p1, %p1029_p0 }
 0x25d   : > { %p1025_p13 = pneg %p1024_p12 }
 0x25f   : > { %p1032_p3 = pnand %p1031_p2, %p1025_p13 }
 0x2ab   : > { %v665_v31 = vpop.permute.xlu0 %664 }
 0x2ac   : > { %v672_v44 = vsel %vm668_vm2, 0.0, %v665_v31 }
 0x2ad   : > { %v667_v32 = vpop.permute.xlu1 %666  ;;  %v681_v54 = vmul.f32 %v676_v41, %v672_v44 }
 0x2ae   : > { %v669_v52 = vsel %vm668_vm2, %v665_v31, %v667_v32  ;;  %v807_v31 = vrot.slane %v1302_v40, %v802_v16  ;;  %v955_v40 = vld [vmem:[%s1389_s7 + $0x18] ss:$0 sm:$0xff] }
 0x2af   : > { %v734_v35 = vpop.permute.xlu0 %733  ;;  %v682_v60 = vmul.f32 %v680_v47, %v669_v52 }
 0x2b0   : > { %v741_v1 = vsel %vm737_vm5, 0.0, %v734_v35 }
 0x2b1   : > { %v736_v37 = vpop.permute.xlu1 %735  ;;  %v750_v12 = vmul.f32 %v745_v58, %v741_v1 }
 0x2b2   : > { %v738_v2 = vsel %vm737_vm5, %v734_v35, %v736_v37 }
 0x2b3   : > { %v688_v42 = vpop.permute.xlu0 %687  ;;  %v751_v13 = vmul.f32 %v749_v61, %v738_v2 }
 0x2b4   : > { %v695_v46 = vsel %vm691_vm3, 0.0, %v688_v42 }
 0x2b5   : > { %v704_v48 = vmul.f32 %v699_v38, %v695_v46  ;;  %v690_v49 = vpop.permute.xlu1 %689 }
 0x2b6   : > { %v692_v53 = vsel %vm691_vm3, %v688_v42, %v690_v49 }
 0x2b7   : > { %v705_v55 = vmul.f32 %v703_v43, %v692_v53  ;;  %v711_v56 = vpop.permute.xlu0 %710  ;;  %v706_v62 = vadd.f32 %v704_v48, %v681_v54 }
 0x2b8   : > { %v718_v59 = vsel %vm714_vm4, 0.0, %v711_v56 }
 0x2b9   : > { %v727_v63 = vmul.f32 %v722_v50, %v718_v59  ;;  %v713_v0 = vpop.permute.xlu1 %712  ;;  %v707_v7 = vadd.f32 %v705_v55, %v682_v60 }
 0x2ba   : > { %v715_v3 = vsel %vm714_vm4, %v711_v56, %v713_v0 }
 0x2bb   : > { %v729_v8 = vadd.f32 %v727_v63, %v706_v62  ;;  %v728_v9 = vmul.f32 %v726_v57, %v715_v3  ;;  %v769_v10 = vpop.permute.xlu0 %768 }
 0x2bd   : > { %v730_v14 = vadd.f32 %v728_v9, %v707_v7  ;;  %v771_v15 = vpop.permute.xlu1 %770  ;;  %v752_v22 = vadd.f32 %v750_v12, %v729_v8 }
 0x2be   : > { %v773_v25 = vsel %vm772_vm6, %v769_v10, %v771_v15  ;;  %v776_v26 = vsel %vm772_vm6, %v771_v15, 0.0 }
 0x2bf   : > { %v753_v23 = vadd.f32 %v751_v13, %v730_v14  ;;  %v792_v24 = vpop.permute.xlu0 %791  ;;  %v764_v34 = vadd.f32 %v762_v27, %v752_v22  ;;  %v785_v35 = vmul.f32 %v780_v18, %v773_v25  ;;  %v786_v37 = vmul.f32 %v784_v19, %v776_v26 }
 0x2c1   : > { %v765_v28 = vadd.f32 %v763_v21, %v753_v23  ;;  %v794_v32 = vpop.permute.xlu1 %793  ;;  %v787_v46 = vadd.f32 %v785_v35, %v764_v34 }
 0x2c2   : > { %v796_v33 = vsel %vm795_vm7, %v792_v24, %v794_v32  ;;  %v799_v30 = vsel %vm795_vm7, %v794_v32, 0.0 }
 0x2c3   : > { %v815_v38 = vpop.permute.xlu0 %814  ;;  %v788_v17 = vadd.f32 %v786_v37, %v765_v28  ;;  %v808_v41 = vmul.f32 %v803_v29, %v796_v33  ;;  %v809_v42 = vmul.f32 %v807_v31, %v799_v30 }
 0x2c5   : > { %v817_v43 = vpop.permute.xlu1 %816  ;;  %v810_v49 = vadd.f32 %v808_v41, %v787_v46  ;;  %v811_v50 = vadd.f32 %v809_v42, %v788_v17 }
 0x2c6   : > { %v819_v44 = vsel %vm818_vm8, %v815_v38, %v817_v43  ;;  %v822_v45 = vsel %vm818_vm8, %v817_v43, 0.0 }
 0x2c7   : > { %v831_v47 = vmul.f32 %v826_v4, %v819_v44  ;;  %v832_v48 = vmul.f32 %v830_v39, %v822_v45  ;;  %v838_v51 = vpop.permute.xlu0 %837 }
 0x2c9   : > { %v840_v52 = vpop.permute.xlu1 %839  ;;  %v833_v55 = vadd.f32 %v831_v47, %v810_v49  ;;  %v834_v56 = vadd.f32 %v832_v48, %v811_v50 }
 0x2ca   : > { %v842_v53 = vsel %vm841_vm9, %v838_v51, %v840_v52  ;;  %v845_v54 = vsel %vm841_vm9, %v840_v52, 0.0 }
 0x2cb   : > { %v854_v57 = vmul.f32 %v954_v36, %v842_v53  ;;  %v855_v58 = vmul.f32 %v955_v40, %v845_v54 }
 0x2cd   : > { %v856_v59 = vadd.f32 %v854_v57, %v833_v55  ;;  %v857_v60 = vadd.f32 %v855_v58, %v834_v56 }
 0x2cf   : > { %859 = vst [vmem:[%s298_s22 + $0x8] sm:$0xff] %v857_v60  ;;  %858 = vst [vmem:[%s298_s22] sm:$0xff] %v856_v59 }
 0x2d0   : > { %1035 = shalt.err (!%p1032_p3)
}
 0x2d1   : > { %s1036_s19 = scalar_lea.hbm %s1345_s26, 256  ;;  %s1040_s21 = scalar_lea.hbm %s1390_s8, 512 }
 0x2d2   : > { %p1037_p4 = scmp.ne.s32.totalorder %s1345_s26, %s1036_s19  ;;  %p1041_p9 = scmp.lt.s32.totalorder %s1345_s26, %s1390_s8 }
 0x2d3   : > { %p1042_p10 = scmp.lt.s32.totalorder %s1040_s21, %s1036_s19 }
 0x2d4   : > { %p1038_p7 = pnand %p1037_p4, %p1178_p5 }
 0x2d5   : > { %p1043_p11 = por %p1042_p10, %p1041_p9 }
 0x2d6   : > { %p1039_p8 = pneg %p1038_p7 }
 0x2d8   : > { %p1044_p12 = pnand %p1043_p11, %p1039_p8 }
 0x2da   : > { %1047 = shalt.err (!%p1044_p12)
}
 0x2db   : > { %971 = dma.vmem_to_hbm [thread:$0]  (%p1178_p5), %s876_s23, 256, %s1345_s26, %s861_s10  }
 0x2dc PF: > { %p977_p13 = scmp.ge.s32.totalorder %s1082_s30, 2  ;;  %s887_s25 = sand.u32 1, %s1070_s27  }
 0x2dd   : > { %s888_s9 = scalar_lea.sflag [#allocation3], %s887_s25 }
 0x2de   : > { %p974_p0 = pnand %p977_p13, %p1182_p6 }
 0x2e0   : > { %p975_p1 = pneg %p974_p0 }
 0x2e2   : > { %1065 = dma.done.wait (%p975_p1), %s888_s9, 256  }
 0x2e3   : > { %1067 = vsyncadd (%p975_p1), %s888_s9, 4294967040  ;;  %p18_p2 = scmp.ge.s32.totalorder %s1165_s11, 4   ;;  %s1393_s27 = smov %s1074_s28 }
 0x2e4   : > { %s1394_s28 = smov %s1078_s29  ;;  %s1395_s29 = smov %s1176_s14 }
 0x2e5   : > { %s1396_s30 = smov %s1165_s11  ;;  %20 = sbr.rel (!%p18_p2) target bundleno = 3 (0x3), region = 87 }
 0x2ea   :  { %893 = vsyncpa [#allocation3], 1 }
 0x2eb   :  { %895 = vsyncpa [#allocation3 + $0x1], 1 }

</bundles_post_ra>
